<compile_context>
chip_gen: v7x
topology: tpu7x:2x2x1
jax: 0.10.0
libtpu: 0.0.40
codegen_flags: <defaults>
</compile_context>

<pallas_src>
import math

import jax
import jax.numpy as jnp
from jax.experimental import pallas as pl
from jax.experimental.pallas import tpu as pltpu


def _jodie_kernel(x_ref, rel_ref, wb_ref, o_ref):
    # rel_ref: (block_n, 1) pre-normalized rel_t, already in x.dtype
    # wb_ref:  (2, C)       row 0 = Linear(1, C) weight, row 1 = bias + 1
    w_row = wb_ref[0:1, :]            # (1, C)
    b1_row = wb_ref[1:2, :]           # (1, C)
    # scale = 1 + (rel_t @ W^T + b)  ==  rel_t * w_row + (b_row + 1)
    scale = rel_ref[...] * w_row + b1_row      # (block_n, C)
    o_ref[...] = x_ref[...] * scale


def _num_tensorcores() -> int:
    """2 on dual-TC parts (v7x), else 1. Fallback: 1."""
    try:
        kind = (jax.devices()[0].device_kind or "").lower()
        if "v7" in kind:
            return 2
    except Exception:
        pass
    return 1


def _vmem_limit_bytes() -> int:
    """Generation-aware scoped-VMEM limit: ~40 MiB on v7x, 64 MiB on v5e/v6e."""
    cap = None
    try:
        cap = getattr(pltpu.get_tpu_info(), "vmem_capacity_bytes", None)
    except Exception:
        cap = None
    if not cap:
        cap = 64 * 1024 * 1024  # conservative (v7x per-TC physical VMEM)
    return min((int(cap) * 5) // 8, 64 * 1024 * 1024)


def _pick_block_n(n: int, c: int, itemsize: int,
                  vmem_budget_bytes: int, min_steps: int) -> int:
    """Largest dtype-aligned row tile fitting the VMEM budget, with >= min_steps grid steps."""
    pack = {4: 8, 2: 16, 1: 32}.get(itemsize, 8)
    # Live VMEM per tile row:
    #   2x double-buffered x tile      : 2 * C
    #   2x double-buffered out tile    : 2 * C
    #   2x double-buffered rel column  : 2 * 128   (lane-padded to 128 lanes)
    per_row = (4 * c + 2 * 128) * itemsize
    max_rows = max(pack, vmem_budget_bytes // max(1, per_row))
    max_rows = max(pack, (max_rows // pack) * pack)
    # Keep >= min_steps grid steps (dual-TC pipelining); single-TC: no clamp
    # beyond "no bigger than N rounded up to the sublane pack".
    target = pl.cdiv(n, max(1, min_steps))
    target = max(pack, ((target + pack - 1) // pack) * pack)
    block_n = min(max_rows, target)
    return max(pack, (block_n // pack) * pack)


def jodie_embedding(x, last_update, t, weight, bias,
                    mean_delta_t: float = 0.0, std_delta_t: float = 1.0,
                    block_n: int | None = None):
    """Pallas implementation of JodieEmbedding.forward.

    x:           (N, C)  float
    last_update: (N,)    float
    t:           (N,)    float
    weight:      (C, 1)  float  (torch Linear(1, C).weight)
    bias:        (C,)    float
    """
    N, C = x.shape
    if N == 0:
        # Mirrors the `rel_t.shape[0] > 0` guard in the torch module.
        return x

    dtype = x.dtype
    itemsize = jnp.dtype(dtype).itemsize

    # --- rel_t normalization in f32 (precision-safe for large timestamps),
    #     then cast to x.dtype exactly like `.to(x.dtype)` in torch. ---------
    inv_std = jnp.float32(1.0 / float(std_delta_t))
    rel_t = (t.astype(jnp.float32) - last_update.astype(jnp.float32)
             - jnp.float32(mean_delta_t)) * inv_std
    rel_col = rel_t.reshape(N, 1).astype(dtype)

    # --- fold constants into a single resident (2, C) side input ------------
    w_row = weight.reshape(1, C).astype(dtype)                       # (1, C)
    b1_row = bias.reshape(1, C).astype(dtype) + jnp.asarray(1.0, dtype)
    wb = jnp.concatenate([w_row, b1_row], axis=0)                    # (2, C)

    # --- generation-aware tile selection; NO padding (Pallas masks the last
    #     partial block's writeback) -----------------------------------------
    vmem_limit = _vmem_limit_bytes()
    if block_n is None:
        block_n = _pick_block_n(
            N, C, itemsize,
            vmem_budget_bytes=(vmem_limit * 3) // 4,   # headroom under the limit
            min_steps=4 if _num_tensorcores() >= 2 else 1,
        )
    grid_n = pl.cdiv(N, block_n)

    cost = pl.CostEstimate(
        flops=3 * N * C,                                         # fma + mul
        transcendentals=0,
        bytes_accessed=2 * N * C * itemsize + N * itemsize + 2 * C * itemsize,
    )

    out = pl.pallas_call(
        _jodie_kernel,
        out_shape=jax.ShapeDtypeStruct((N, C), dtype),
        grid_spec=pltpu.PrefetchScalarGridSpec(
            num_scalar_prefetch=0,
            grid=(grid_n,),
            in_specs=[
                pl.BlockSpec((block_n, C), lambda i: (i, 0)),   # x tile
                pl.BlockSpec((block_n, 1), lambda i: (i, 0)),   # rel_t column
                pl.BlockSpec((2, C), lambda i: (0, 0)),         # [W ; bias+1] resident
            ],
            out_specs=pl.BlockSpec((block_n, C), lambda i: (i, 0)),
        ),
        compiler_params=pltpu.CompilerParams(
            dimension_semantics=("parallel",),
            vmem_limit_bytes=vmem_limit,
        ),
        cost_estimate=cost,
    )(x, rel_col, wb)
    return out


def _reference(x, last_update, t, weight, bias, mean_delta_t, std_delta_t):
    rel_t = (t.astype(jnp.float32) - last_update.astype(jnp.float32)
             - mean_delta_t) / std_delta_t
    proj = rel_t.reshape(-1, 1).astype(x.dtype) @ weight.T.astype(x.dtype) \
        + bias.astype(x.dtype)
    return x * (1.0 + proj)


if __name__ == "__main__":
    key = jax.random.PRNGKey(0)
    # N deliberately NOT a multiple of typical block sizes (exercises the
    # masked partial-block path); C = 128 keeps output stores lane-dense.
    N, C = 200, 128
    mean_delta_t, std_delta_t = 0.5, 2.0

    kx, klu, kt, kw, kb = jax.random.split(key, 5)
    x = jax.random.normal(kx, (N, C), dtype=jnp.float32)
    last_update = jax.random.uniform(klu, (N,), dtype=jnp.float32, maxval=10.0)
    t = last_update + jax.random.uniform(kt, (N,), dtype=jnp.float32, maxval=5.0)

    # NormalLinear(1, C): weight ~ N(0, stdv), bias ~ N(0, stdv), stdv = 1/sqrt(1)
    stdv = 1.0 / math.sqrt(1.0)
    weight = stdv * jax.random.normal(kw, (C, 1), dtype=jnp.float32)
    bias = stdv * jax.random.normal(kb, (C,), dtype=jnp.float32)

    out = jodie_embedding(x, last_update, t, weight, bias,
                          mean_delta_t=mean_delta_t, std_delta_t=std_delta_t)
    out = jax.block_until_ready(out)

    ref = _reference(x, last_update, t, weight, bias, mean_delta_t, std_delta_t)
    assert out.shape == (N, C)
    assert jnp.allclose(out, ref, atol=1e-5, rtol=1e-5), "mismatch vs reference"

    print("KERNEL_OK")
</pallas_src>

<mosaic_0001>
module attributes {stable_mosaic.version = 11 : i64} {
  func.func @_jodie_kernel(%arg0: i32, %arg1: memref<200x128xf32, #tpu.memory_space<vmem>>, %arg2: memref<200x1xf32, #tpu.memory_space<vmem>>, %arg3: memref<2x128xf32, #tpu.memory_space<vmem>>, %arg4: memref<200x128xf32, #tpu.memory_space<vmem>>) attributes {dimension_semantics = [#tpu.dimension_semantics<parallel>], iteration_bounds = array<i64: 1>, scalar_prefetch = 0 : i64, scratch_operands = 0 : i64, tpu.core_type = #tpu.core_type<tc>, window_params = [{transform_indices = @transform_0, window_bounds = array<i64: 200, 128>}, {transform_indices = @transform_1, window_bounds = array<i64: 200, 1>}, {pipeline_mode = #tpu.pipeline_mode<synchronous>, transform_indices = @transform_2, window_bounds = array<i64: 2, 128>}, {transform_indices = @transform_3, window_bounds = array<i64: 200, 128>}]} {
    %c0 = arith.constant 0 : index
    %c0_0 = arith.constant 0 : index
    %0 = vector.load %arg3[%c0, %c0_0] : memref<2x128xf32, #tpu.memory_space<vmem>>, vector<1x128xf32>
    %c1 = arith.constant 1 : index
    %c0_1 = arith.constant 0 : index
    %1 = vector.load %arg3[%c1, %c0_1] : memref<2x128xf32, #tpu.memory_space<vmem>>, vector<1x128xf32>
    %c0_2 = arith.constant 0 : index
    %c0_3 = arith.constant 0 : index
    %2 = vector.load %arg2[%c0_2, %c0_3] : memref<200x1xf32, #tpu.memory_space<vmem>>, vector<200x1xf32>
    %3 = vector.broadcast %2 : vector<200x1xf32> to vector<200x128xf32>
    %4 = vector.broadcast %0 : vector<1x128xf32> to vector<200x128xf32>
    %5 = arith.mulf %3, %4 : vector<200x128xf32>
    %6 = vector.broadcast %1 : vector<1x128xf32> to vector<200x128xf32>
    %7 = arith.addf %5, %6 : vector<200x128xf32>
    %c0_4 = arith.constant 0 : index
    %c0_5 = arith.constant 0 : index
    %8 = vector.load %arg1[%c0_4, %c0_5] : memref<200x128xf32, #tpu.memory_space<vmem>>, vector<200x128xf32>
    %9 = arith.mulf %8, %7 : vector<200x128xf32>
    %c0_6 = arith.constant 0 : index
    %c0_7 = arith.constant 0 : index
    %10 = vector.load %arg4[%c0_6, %c0_7] : memref<200x128xf32, #tpu.memory_space<vmem>>, vector<200x128xf32>
    tpu.vector_store %arg4[%c0_6, %c0_7], %9 {strides = array<i32>} : memref<200x128xf32, #tpu.memory_space<vmem>>, vector<200x128xf32>,
    return
  }
  func.func @transform_0(%arg0: i32) -> (i32, i32) {
    %c0_i32 = arith.constant 0 : i32
    %c0_i32_0 = arith.constant 0 : i32
    return %arg0, %c0_i32 : i32, i32
  }
  func.func @transform_1(%arg0: i32) -> (i32, i32) {
    %c0_i32 = arith.constant 0 : i32
    %c0_i32_0 = arith.constant 0 : i32
    return %arg0, %c0_i32 : i32, i32
  }
  func.func @transform_2(%arg0: i32) -> (i32, i32) {
    %c0_i32 = arith.constant 0 : i32
    %c0_i32_0 = arith.constant 0 : i32
    %c0_i32_1 = arith.constant 0 : i32
    return %c0_i32, %c0_i32_0 : i32, i32
  }
  func.func @transform_3(%arg0: i32) -> (i32, i32) {
    %c0_i32 = arith.constant 0 : i32
    %c0_i32_0 = arith.constant 0 : i32
    return %arg0, %c0_i32 : i32, i32
  }
}

</mosaic_0001>

<bundles_post_ra>
// kernel: tpu_custom_call.1
= control target key start
LH: loop header
LB: loop body
LE: loop exit
PB: predicated region body
PF: predicated region fallthrough
CT: control target
= control target key end

     0   :  { %v348_v2 = vmov 0   ;;  %s594_s0 = inlined_call_operand.vmem [shape: f32[200,128], index: 0, kind: input, shape index: {}]   ;;  %s595_s1 = inlined_call_operand.vmem [shape: f32[200,1], index: 1, kind: input, shape index: {}]   ;;  %s596_s2 = inlined_call_operand.vmem [shape: f32[2,128], index: 2, kind: input, shape index: {}]   ;;  %s597_s3 = inlined_call_operand.hbm [shape: f32[200,128], index: 3, kind: output, shape index: {}]  }
   0x1   :  { %v19_v0 = vld [vmem:[%s595_s1 + $0x10] sm:$0xff]  ;;  %v17_v1 = vld [vmem:[%s595_s1] sm:$0xff]  ;;  %323 = vset.pattern.permute.xlu1 %v348_v2  ;;  %322 = vset.pattern.permute.xlu0 %v348_v2  ;;  %v20_v3 = vld [vmem:[%s595_s1 + $0x18] sm:$0xff] }
   0x2   :  { %54 = vperm.xlu1 %323, %v19_v0   ;;  %44 = vperm.xlu0 %322, %v17_v1   ;;  %v18_v4 = vld [vmem:[%s595_s1 + $0x8] sm:$0xff]  ;;  %v21_v6 = vld [vmem:[%s595_s1 + $0x20] sm:$0xff] }
   0x3   :  { %v22_v5 = vld [vmem:[%s595_s1 + $0x28] sm:$0xff] }
   0x6   :  { %59 = vperm.xlu1 %323, %v20_v3   ;;  %49 = vperm.xlu0 %322, %v18_v4  }
   0xa   :  { %69 = vperm.xlu1 %323, %v22_v5   ;;  %64 = vperm.xlu0 %322, %v21_v6  }
   0xb   :  { %8 = vsyncpa [#allocation3], 0  ;;  %v24_v7 = vld [vmem:[%s595_s1 + $0x38] sm:$0xff]  ;;  %v23_v8 = vld [vmem:[%s595_s1 + $0x30] sm:$0xff]  ;;  %s349_s29 = smov [#allocation2]  }
   0xc   :  { %v26_v9 = vld [vmem:[%s595_s1 + $0x48] sm:$0xff]  ;;  %v25_v10 = vld [vmem:[%s595_s1 + $0x40] sm:$0xff]  ;;  %v28_v11 = vld [vmem:[%s595_s1 + $0x58] sm:$0xff]  ;;  %s305_s30 = sshll.u32 %s349_s29, 4  ;;  %s306_s30 = int_to_ptr.vmem [resolvable:$true] %s305_s30 }
   0xd   :  { %v27_v12 = vld [vmem:[%s595_s1 + $0x50] sm:$0xff]  ;;  %v30_v13 = vld [vmem:[%s595_s1 + $0x68] sm:$0xff]  ;;  %v29_v14 = vld [vmem:[%s595_s1 + $0x60] sm:$0xff]  ;;  %s324_s6 = scalar_lea.vmem %s306_s30, 3200  ;;  %p329_p1 = scmp.lt.s32.totalorder %s306_s30, %s306_s30 }
   0xe   :  { %79 = vperm.xlu1 %323, %v24_v7   ;;  %74 = vperm.xlu0 %322, %v23_v8   ;;  %v32_v15 = vld [vmem:[%s595_s1 + $0x78] sm:$0xff]  ;;  %v31_v16 = vld [vmem:[%s595_s1 + $0x70] sm:$0xff]  ;;  %v34_v17 = vld [vmem:[%s595_s1 + $0x88] sm:$0xff]  ;;  %p325_p0 = scmp.ne.s32.totalorder %s306_s30, %s324_s6  ;;  %p330_p2 = scmp.lt.s32.totalorder %s324_s6, %s324_s6 }
   0xf   :  { %v33_v18 = vld [vmem:[%s595_s1 + $0x80] sm:$0xff]  ;;  %v36_v19 = vld [vmem:[%s595_s1 + $0x98] sm:$0xff]  ;;  %v35_v20 = vld [vmem:[%s595_s1 + $0x90] sm:$0xff] }
  0x10   :  { %v38_v21 = vld [vmem:[%s595_s1 + $0xa8] sm:$0xff]  ;;  %v37_v22 = vld [vmem:[%s595_s1 + $0xa0] sm:$0xff]  ;;  %v40_v23 = vld [vmem:[%s595_s1 + $0xb8] sm:$0xff]  ;;  %p331_p3 = por %p330_p2, %p329_p1 }
  0x11   :  { %v39_v24 = vld [vmem:[%s595_s1 + $0xb0] sm:$0xff]  ;;  %v41_v25 = vld [vmem:[%s595_s1 + $0xc0] sm:$0xff]  ;;  %v228_v42 = vld [vmem:[%s594_s0 + $0x18] sm:$0xff] }
  0x12   :  { %89 = vperm.xlu1 %323, %v26_v9   ;;  %84 = vperm.xlu0 %322, %v25_v10   ;;  %v450_v26 = vld [vmem:[%s596_s2] ss:$0 sm:$0xff]  ;;  %v455_v28 = vld [vmem:[%s596_s2 + $0x1] ss:$0 sm:$0xff]  ;;  %v227_v32 = vld [vmem:[%s594_s0 + $0x10] sm:$0xff]  ;;  %p332_p4 = pnand %p331_p3, %p325_p0 }
  0x13   :  { %v225_v33 = vld [vmem:[%s594_s0] sm:$0xff]  ;;  %v226_v43 = vld [vmem:[%s594_s0 + $0x8] sm:$0xff]  ;;  %v232_v62 = vld [vmem:[%s594_s0 + $0x38] sm:$0xff] }
  0x14   :  { %v230_v52 = vld [vmem:[%s594_s0 + $0x28] sm:$0xff]  ;;  %v229_v53 = vld [vmem:[%s594_s0 + $0x20] sm:$0xff]  ;;  %v231_v63 = vld [vmem:[%s594_s0 + $0x30] sm:$0xff] }
  0x15   :  { %v234_v8 = vld [vmem:[%s594_s0 + $0x48] sm:$0xff]  ;;  %v233_v9 = vld [vmem:[%s594_s0 + $0x40] sm:$0xff] }
  0x16   :  { %99 = vperm.xlu1 %323, %v28_v11   ;;  %94 = vperm.xlu0 %322, %v27_v12  }
  0x1a   :  { %109 = vperm.xlu1 %323, %v30_v13   ;;  %104 = vperm.xlu0 %322, %v29_v14  }
  0x1e   :  { %119 = vperm.xlu1 %323, %v32_v15   ;;  %114 = vperm.xlu0 %322, %v31_v16  }
  0x22   :  { %129 = vperm.xlu1 %323, %v34_v17   ;;  %124 = vperm.xlu0 %322, %v33_v18   ;;  %v236_v18 = vld [vmem:[%s594_s0 + $0x58] sm:$0xff] }
  0x26   :  { %139 = vperm.xlu1 %323, %v36_v19   ;;  %134 = vperm.xlu0 %322, %v35_v20   ;;  %v235_v19 = vld [vmem:[%s594_s0 + $0x50] sm:$0xff] }
  0x2a   :  { %149 = vperm.xlu1 %323, %v38_v21   ;;  %144 = vperm.xlu0 %322, %v37_v22  }
  0x2e   :  { %159 = vperm.xlu1 %323, %v40_v23   ;;  %154 = vperm.xlu0 %322, %v39_v24  }
  0x32   :  { %164 = vperm.xlu0 %322, %v41_v25  }
  0x81   :  { %v55_v27 = vpop.permute.xlu1 %54  ;;  %v45_v29 = vpop.permute.xlu0 %44 }
  0x82   :  { %v173_v30 = vmul.f32 %v450_v26, %v55_v27  ;;  %v171_v31 = vmul.f32 %v450_v26, %v45_v29 }
  0x84   :  { %v202_v34 = vadd.f32 %v455_v28, %v173_v30  ;;  %v200_v35 = vadd.f32 %v455_v28, %v171_v31  ;;  %v238_v30 = vld [vmem:[%s594_s0 + $0x68] sm:$0xff]  ;;  %v237_v31 = vld [vmem:[%s594_s0 + $0x60] sm:$0xff] }
  0x85   :  { %v60_v36 = vpop.permute.xlu1 %59  ;;  %v50_v37 = vpop.permute.xlu0 %49 }
  0x86   :  { %v252_v38 = vmul.f32 %v227_v32, %v202_v34  ;;  %v250_v39 = vmul.f32 %v225_v33, %v200_v35  ;;  %v174_v40 = vmul.f32 %v450_v26, %v60_v36  ;;  %v172_v41 = vmul.f32 %v450_v26, %v50_v37 }
  0x88   :  { %277 = vst [vmem:[#allocation2 + $0x10] sm:$0xff] %v252_v38  ;;  %275 = vst [vmem:[#allocation2] sm:$0xff] %v250_v39  ;;  %v203_v44 = vadd.f32 %v455_v28, %v174_v40  ;;  %v201_v45 = vadd.f32 %v455_v28, %v172_v41  ;;  %v240_v40 = vld [vmem:[%s594_s0 + $0x78] sm:$0xff]  ;;  %v239_v41 = vld [vmem:[%s594_s0 + $0x70] sm:$0xff] }
  0x89   :  { %v70_v46 = vpop.permute.xlu1 %69  ;;  %v65_v47 = vpop.permute.xlu0 %64 }
  0x8a   :  { %v253_v48 = vmul.f32 %v228_v42, %v203_v44  ;;  %v251_v49 = vmul.f32 %v226_v43, %v201_v45  ;;  %v176_v50 = vmul.f32 %v450_v26, %v70_v46  ;;  %v175_v51 = vmul.f32 %v450_v26, %v65_v47 }
  0x8c   :  { %278 = vst [vmem:[#allocation2 + $0x18] sm:$0xff] %v253_v48  ;;  %276 = vst [vmem:[#allocation2 + $0x8] sm:$0xff] %v251_v49  ;;  %v205_v54 = vadd.f32 %v455_v28, %v176_v50  ;;  %v204_v55 = vadd.f32 %v455_v28, %v175_v51  ;;  %v242_v50 = vld [vmem:[%s594_s0 + $0x88] sm:$0xff]  ;;  %v241_v51 = vld [vmem:[%s594_s0 + $0x80] sm:$0xff] }
  0x8d   :  { %v80_v56 = vpop.permute.xlu1 %79  ;;  %v75_v57 = vpop.permute.xlu0 %74 }
  0x8e   :  { %v255_v58 = vmul.f32 %v230_v52, %v205_v54  ;;  %v254_v59 = vmul.f32 %v229_v53, %v204_v55  ;;  %v178_v60 = vmul.f32 %v450_v26, %v80_v56  ;;  %v177_v61 = vmul.f32 %v450_v26, %v75_v57 }
  0x90   :  { %280 = vst [vmem:[#allocation2 + $0x28] sm:$0xff] %v255_v58  ;;  %279 = vst [vmem:[#allocation2 + $0x20] sm:$0xff] %v254_v59  ;;  %v207_v0 = vadd.f32 %v455_v28, %v178_v60  ;;  %v206_v1 = vadd.f32 %v455_v28, %v177_v61  ;;  %v244_v60 = vld [vmem:[%s594_s0 + $0x98] sm:$0xff]  ;;  %v243_v61 = vld [vmem:[%s594_s0 + $0x90] sm:$0xff] }
  0x91   :  { %v90_v2 = vpop.permute.xlu1 %89  ;;  %v85_v3 = vpop.permute.xlu0 %84 }
  0x92   :  { %v257_v4 = vmul.f32 %v232_v62, %v207_v0  ;;  %v256_v5 = vmul.f32 %v231_v63, %v206_v1  ;;  %v180_v6 = vmul.f32 %v450_v26, %v90_v2  ;;  %v179_v7 = vmul.f32 %v450_v26, %v85_v3 }
  0x94   :  { %282 = vst [vmem:[#allocation2 + $0x38] sm:$0xff] %v257_v4  ;;  %281 = vst [vmem:[#allocation2 + $0x30] sm:$0xff] %v256_v5  ;;  %v209_v10 = vadd.f32 %v455_v28, %v180_v6  ;;  %v208_v11 = vadd.f32 %v455_v28, %v179_v7  ;;  %v246_v6 = vld [vmem:[%s594_s0 + $0xa8] sm:$0xff]  ;;  %v245_v7 = vld [vmem:[%s594_s0 + $0xa0] sm:$0xff] }
  0x95   :  { %v100_v12 = vpop.permute.xlu1 %99  ;;  %v95_v13 = vpop.permute.xlu0 %94 }
  0x96   :  { %v259_v14 = vmul.f32 %v234_v8, %v209_v10  ;;  %v258_v15 = vmul.f32 %v233_v9, %v208_v11  ;;  %v182_v16 = vmul.f32 %v450_v26, %v100_v12  ;;  %v181_v17 = vmul.f32 %v450_v26, %v95_v13 }
  0x98   :  { %284 = vst [vmem:[#allocation2 + $0x48] sm:$0xff] %v259_v14  ;;  %283 = vst [vmem:[#allocation2 + $0x40] sm:$0xff] %v258_v15  ;;  %v211_v20 = vadd.f32 %v455_v28, %v182_v16  ;;  %v210_v21 = vadd.f32 %v455_v28, %v181_v17  ;;  %v248_v16 = vld [vmem:[%s594_s0 + $0xb8] sm:$0xff]  ;;  %v247_v17 = vld [vmem:[%s594_s0 + $0xb0] sm:$0xff] }
  0x99   :  { %v110_v22 = vpop.permute.xlu1 %109  ;;  %v105_v23 = vpop.permute.xlu0 %104 }
  0x9a   :  { %v261_v24 = vmul.f32 %v236_v18, %v211_v20  ;;  %v260_v25 = vmul.f32 %v235_v19, %v210_v21  ;;  %v184_v27 = vmul.f32 %v450_v26, %v110_v22  ;;  %v183_v29 = vmul.f32 %v450_v26, %v105_v23 }
  0x9c   :  { %286 = vst [vmem:[#allocation2 + $0x58] sm:$0xff] %v261_v24  ;;  %285 = vst [vmem:[#allocation2 + $0x50] sm:$0xff] %v260_v25  ;;  %v213_v32 = vadd.f32 %v455_v28, %v184_v27  ;;  %v212_v33 = vadd.f32 %v455_v28, %v183_v29  ;;  %v249_v24 = vld [vmem:[%s594_s0 + $0xc0] sm:$0xff] }
  0x9d   :  { %v120_v34 = vpop.permute.xlu1 %119  ;;  %v115_v35 = vpop.permute.xlu0 %114 }
  0x9e   :  { %v263_v36 = vmul.f32 %v238_v30, %v213_v32  ;;  %v262_v37 = vmul.f32 %v237_v31, %v212_v33  ;;  %v186_v38 = vmul.f32 %v450_v26, %v120_v34  ;;  %v185_v39 = vmul.f32 %v450_v26, %v115_v35 }
  0xa0   :  { %288 = vst [vmem:[#allocation2 + $0x68] sm:$0xff] %v263_v36  ;;  %287 = vst [vmem:[#allocation2 + $0x60] sm:$0xff] %v262_v37  ;;  %v215_v42 = vadd.f32 %v455_v28, %v186_v38  ;;  %v214_v43 = vadd.f32 %v455_v28, %v185_v39 }
  0xa1   :  { %v130_v44 = vpop.permute.xlu1 %129  ;;  %v125_v45 = vpop.permute.xlu0 %124 }
  0xa2   :  { %v265_v46 = vmul.f32 %v240_v40, %v215_v42  ;;  %v264_v47 = vmul.f32 %v239_v41, %v214_v43  ;;  %v188_v48 = vmul.f32 %v450_v26, %v130_v44  ;;  %v187_v49 = vmul.f32 %v450_v26, %v125_v45 }
  0xa4   :  { %290 = vst [vmem:[#allocation2 + $0x78] sm:$0xff] %v265_v46  ;;  %289 = vst [vmem:[#allocation2 + $0x70] sm:$0xff] %v264_v47  ;;  %v217_v52 = vadd.f32 %v455_v28, %v188_v48  ;;  %v216_v53 = vadd.f32 %v455_v28, %v187_v49 }
  0xa5   :  { %v140_v54 = vpop.permute.xlu1 %139  ;;  %v135_v55 = vpop.permute.xlu0 %134 }
  0xa6   :  { %v267_v56 = vmul.f32 %v242_v50, %v217_v52  ;;  %v266_v57 = vmul.f32 %v241_v51, %v216_v53  ;;  %v190_v58 = vmul.f32 %v450_v26, %v140_v54  ;;  %v189_v59 = vmul.f32 %v450_v26, %v135_v55 }
  0xa8   :  { %292 = vst [vmem:[#allocation2 + $0x88] sm:$0xff] %v267_v56  ;;  %291 = vst [vmem:[#allocation2 + $0x80] sm:$0xff] %v266_v57  ;;  %v219_v62 = vadd.f32 %v455_v28, %v190_v58  ;;  %v218_v63 = vadd.f32 %v455_v28, %v189_v59 }
  0xa9   :  { %v150_v0 = vpop.permute.xlu1 %149  ;;  %v145_v1 = vpop.permute.xlu0 %144 }
  0xaa   :  { %v269_v2 = vmul.f32 %v244_v60, %v219_v62  ;;  %v268_v3 = vmul.f32 %v243_v61, %v218_v63  ;;  %v192_v4 = vmul.f32 %v450_v26, %v150_v0  ;;  %v191_v5 = vmul.f32 %v450_v26, %v145_v1 }
  0xac   :  { %294 = vst [vmem:[#allocation2 + $0x98] sm:$0xff] %v269_v2  ;;  %293 = vst [vmem:[#allocation2 + $0x90] sm:$0xff] %v268_v3  ;;  %v221_v8 = vadd.f32 %v455_v28, %v192_v4  ;;  %v220_v9 = vadd.f32 %v455_v28, %v191_v5 }
  0xad   :  { %v160_v10 = vpop.permute.xlu1 %159  ;;  %v155_v11 = vpop.permute.xlu0 %154 }
  0xae   :  { %v271_v12 = vmul.f32 %v246_v6, %v221_v8  ;;  %v270_v13 = vmul.f32 %v245_v7, %v220_v9  ;;  %v194_v14 = vmul.f32 %v450_v26, %v160_v10  ;;  %v193_v15 = vmul.f32 %v450_v26, %v155_v11 }
  0xb0   :  { %296 = vst [vmem:[#allocation2 + $0xa8] sm:$0xff] %v271_v12  ;;  %295 = vst [vmem:[#allocation2 + $0xa0] sm:$0xff] %v270_v13  ;;  %v223_v18 = vadd.f32 %v455_v28, %v194_v14  ;;  %v222_v19 = vadd.f32 %v455_v28, %v193_v15 }
  0xb1   :  { %v165_v20 = vpop.permute.xlu0 %164 }
  0xb2   :  { %v273_v21 = vmul.f32 %v248_v16, %v223_v18  ;;  %v272_v22 = vmul.f32 %v247_v17, %v222_v19  ;;  %v195_v23 = vmul.f32 %v450_v26, %v165_v20 }
  0xb4   :  { %298 = vst [vmem:[#allocation2 + $0xb8] sm:$0xff] %v273_v21  ;;  %297 = vst [vmem:[#allocation2 + $0xb0] sm:$0xff] %v272_v22  ;;  %v224_v25 = vadd.f32 %v455_v28, %v195_v23 }
  0xb6   :  { %v274_v27 = vmul.f32 %v249_v24, %v224_v25 }
  0xb8   :  { %299 = vst [vmem:[#allocation2 + $0xc0] sm:$0xff] %v274_v27 }
  0xb9   :  { %335 = shalt.err (!%p332_p4)
}
  0xba   :  { %s336_s9 = scalar_lea.hbm %s597_s3, 3200 }
  0xbb   :  { %p337_p5 = scmp.ne.s32.totalorder %s597_s3, %s336_s9  ;;  %p340_p6 = scmp.lt.u32.totalorder %s336_s9, %s597_s3 }
  0xbd   :  { %p342_p7 = pnand %p340_p6, %p337_p5 }
  0xbf   :  { %345 = shalt.err (!%p342_p7)
}
  0xc0   :  { %s350_s13 = smov 128   ;;  %s351_s1 = smov 8  }
  0xc1   :  { %311 = dma.vmem_to_hbm [thread:$0]  %s306_s30, 3200, %s597_s3, [#allocation3], %s350_s13, %s350_s13, %s351_s1  }
  0xc2   :  { %346 = dma.done.wait [#allocation3], 3200  }
  0xc3   :  { %347 = vsyncadd [#allocation3], 4294964096 }
  0xc4   :  { %315 = vsyncpa [#allocation3], 1 }

</bundles_post_ra>
